<compile_context>
chip_gen: v5e
topology: v5e:2x2
jax: 0.10.0
libtpu: 0.0.40
codegen_flags: <defaults>
</compile_context>

<pallas_src>
import jax
import jax.numpy as jnp
from jax.experimental import pallas as pl
from jax.experimental.pallas import tpu as pltpu


def decoder_kernel(x_ref, w1_ref, b1_ref, w2_ref, b2_ref, o_ref):
    """Fused 2-layer MLP on one batch tile: relu(x @ W1 + b1) @ W2 + b2.

    W1 is (in, hidden) and W2 is (hidden, out) -- already transposed in the
    prep step, so both dots are straight MXU contractions with f32 accum.
    """
    # Layer 0: Linear(input_size -> hidden_size) + ReLU (VPU).
    h = jnp.dot(x_ref[...], w1_ref[...], preferred_element_type=jnp.float32)
    h = jnp.maximum(h + b1_ref[...], 0.0)

    # Dropout(p=0.5): identity in eval/inference mode.
    # TODO(synk): training-mode dropout (pltpu.prng_seed + stateful_bernoulli)
    # is omitted; it cannot bit-match PyTorch's RNG stream anyway.

    # Layer 1: Linear(hidden_size -> output_size). Output block is unpadded;
    # its last dim equals the full output width, so the BlockSpec is legal
    # and there is no post-kernel slice.
    y = jnp.dot(h.astype(w2_ref.dtype), w2_ref[...],
                preferred_element_type=jnp.float32)
    o_ref[...] = (y + b2_ref[...]).astype(o_ref.dtype)


def prepare_decoder_params(w1, b1, w2, b2):
    """One-time parameter prep (hoisted out of the per-call path).

    Transpose PyTorch-layout (out, in) weights to (in, out) so the MXU
    consumes them with no in-kernel transpose, and reshape biases to (1, out).
    No lane padding: the unpadded output block is stored directly.
    """
    w1t = jnp.asarray(w1).T                    # (in, hidden)
    b1r = jnp.asarray(b1).reshape(1, -1)       # (1, hidden)
    w2t = jnp.asarray(w2).T                    # (hidden, out)
    b2r = jnp.asarray(b2).reshape(1, -1)       # (1, out)
    return w1t, b1r, w2t, b2r


def _num_tensorcores():
    """Best-effort TensorCore-per-chip count (2 on v7x, else 1)."""
    try:
        kind = jax.devices()[0].device_kind.lower()
        if "v7" in kind:
            return 2
    except Exception:
        pass
    return 1


def decoder_forward(x, w1t, b1r, w2t, b2r):
    """Run the fused decoder MLP. Grid = 1 step (v5e/v6e) or 2 steps (v7x)."""
    batch, in_size = x.shape
    hidden = w1t.shape[1]
    out_size = w2t.shape[1]

    # Collapse the grid: one step per TensorCore.  Per-step overhead
    # (~0.35 us) dwarfs the real HBM traffic at these shapes, so more steps
    # are pure overhead.  Batch tile is a multiple of 8 (or the full batch).
    n_cores = _num_tensorcores()
    if n_cores > 1 and batch >= 16:
        tm = ((pl.cdiv(batch, n_cores) + 7) // 8) * 8
    else:
        tm = batch
    grid = (pl.cdiv(batch, tm),)
    # Partial last tile (batch % tm != 0): garbage padding rows pass through
    # the MXU but only affect masked-out output rows -- results are correct.

    flops = 2 * batch * (in_size * hidden + hidden * out_size)
    bytes_accessed = (x.nbytes + w1t.nbytes + b1r.nbytes + w2t.nbytes
                      + b2r.nbytes + batch * out_size * x.dtype.itemsize)

    return pl.pallas_call(
        decoder_kernel,
        out_shape=jax.ShapeDtypeStruct((batch, out_size), x.dtype),
        grid=grid,
        in_specs=[
            pl.BlockSpec((tm, in_size), lambda i: (i, 0)),       # x: streamed
            pl.BlockSpec((in_size, hidden), lambda i: (0, 0)),   # W1: resident
            pl.BlockSpec((1, hidden), lambda i: (0, 0)),         # b1: resident
            pl.BlockSpec((hidden, out_size), lambda i: (0, 0)),  # W2: resident
            pl.BlockSpec((1, out_size), lambda i: (0, 0)),       # b2: resident
        ],
        out_specs=pl.BlockSpec((tm, out_size), lambda i: (i, 0)),
        compiler_params=pltpu.CompilerParams(
            dimension_semantics=("parallel",)),
        cost_estimate=pl.CostEstimate(
            flops=flops, transcendentals=0, bytes_accessed=bytes_accessed),
    )(x, w1t, b1r, w2t, b2r)


def init_linear_params(key, in_size, out_size):
    """Deterministic PyTorch-style init: U(-1/sqrt(in), 1/sqrt(in))."""
    kw, kb = jax.random.split(key)
    bound = 1.0 / jnp.sqrt(jnp.float32(in_size))
    w = jax.random.uniform(kw, (out_size, in_size), jnp.float32, -bound, bound)
    b = jax.random.uniform(kb, (out_size,), jnp.float32, -bound, bound)
    return w, b


def reference_forward(x, w1, b1, w2, b2):
    """Pure-JAX reference (eval mode: dropout is identity), PyTorch layout."""
    h = jnp.maximum(x @ w1.T + b1, 0.0)
    return h @ w2.T + b2


if __name__ == "__main__":
    # Shapes consistent with the module: input_size=32, hidden_size=16,
    # output_size=8.  Batch=256 exercises the grid logic (1 step on a
    # single-TC chip, 2 x 128-row steps on v7x).
    batch, input_size, hidden_size, output_size = 256, 32, 16, 8

    key = jax.random.PRNGKey(0)
    kx, k1, k2 = jax.random.split(key, 3)

    x = jax.random.normal(kx, (batch, input_size), jnp.float32)
    w1, b1 = init_linear_params(k1, input_size, hidden_size)
    w2, b2 = init_linear_params(k2, hidden_size, output_size)

    # One-time parameter prep (weight transpose / bias reshape).
    w1t, b1r, w2t, b2r = prepare_decoder_params(w1, b1, w2, b2)

    out = decoder_forward(x, w1t, b1r, w2t, b2r)
    out = jax.block_until_ready(out)

    ref = reference_forward(x, w1, b1, w2, b2)
    assert out.shape == (batch, output_size)
    # Slightly loosened tolerance: f32 MXU operands go through bf16
    # multi-pass emulation on these chips.
    assert jnp.allclose(out, ref, atol=1e-4, rtol=1e-4), "mismatch vs reference"

    print("KERNEL_OK")
</pallas_src>

<mosaic_0001>
module attributes {stable_mosaic.version = 11 : i64} {
  func.func @decoder_kernel(%arg0: i32, %arg1: memref<256x32xf32, #tpu.memory_space<vmem>>, %arg2: memref<32x16xf32, #tpu.memory_space<vmem>>, %arg3: memref<1x16xf32, #tpu.memory_space<vmem>>, %arg4: memref<16x8xf32, #tpu.memory_space<vmem>>, %arg5: memref<1x8xf32, #tpu.memory_space<vmem>>, %arg6: memref<256x8xf32, #tpu.memory_space<vmem>>) attributes {dimension_semantics = [#tpu.dimension_semantics<parallel>], iteration_bounds = array<i64: 1>, scalar_prefetch = 0 : i64, scratch_operands = 0 : i64, tpu.core_type = #tpu.core_type<tc>, window_params = [{transform_indices = @transform_0, window_bounds = array<i64: 256, 32>}, {pipeline_mode = #tpu.pipeline_mode<synchronous>, transform_indices = @transform_1, window_bounds = array<i64: 32, 16>}, {pipeline_mode = #tpu.pipeline_mode<synchronous>, transform_indices = @transform_2, window_bounds = array<i64: 1, 16>}, {pipeline_mode = #tpu.pipeline_mode<synchronous>, transform_indices = @transform_3, window_bounds = array<i64: 16, 8>}, {pipeline_mode = #tpu.pipeline_mode<synchronous>, transform_indices = @transform_4, window_bounds = array<i64: 1, 8>}, {transform_indices = @transform_5, window_bounds = array<i64: 256, 8>}]} {
    %c0 = arith.constant 0 : index
    %c0_0 = arith.constant 0 : index
    %0 = vector.load %arg1[%c0, %c0_0] : memref<256x32xf32, #tpu.memory_space<vmem>>, vector<256x32xf32>
    %c0_1 = arith.constant 0 : index
    %c0_2 = arith.constant 0 : index
    %1 = vector.load %arg2[%c0_1, %c0_2] : memref<32x16xf32, #tpu.memory_space<vmem>>, vector<32x16xf32>
    %cst = arith.constant dense<0.000000e+00> : vector<256x16xf32>
    %2 = tpu.matmul %0, %1, %cst {dimension_numbers = #tpu.dot_dimension_numbers<[1], [0], [0], [1], [0, 0, 1, 1], [], []>} : vector<256x32xf32>, vector<32x16xf32>, vector<256x16xf32> -> vector<256x16xf32>
    %c0_3 = arith.constant 0 : index
    %c0_4 = arith.constant 0 : index
    %3 = vector.load %arg3[%c0_3, %c0_4] : memref<1x16xf32, #tpu.memory_space<vmem>>, vector<1x16xf32>
    %4 = vector.broadcast %3 : vector<1x16xf32> to vector<256x16xf32>
    %5 = arith.addf %2, %4 : vector<256x16xf32>
    %cst_5 = arith.constant 0.000000e+00 : f32
    %6 = vector.broadcast %cst_5 : f32 to vector<256x16xf32>
    %7 = arith.maximumf %5, %6 : vector<256x16xf32>
    %c0_6 = arith.constant 0 : index
    %c0_7 = arith.constant 0 : index
    %8 = vector.load %arg4[%c0_6, %c0_7] : memref<16x8xf32, #tpu.memory_space<vmem>>, vector<16x8xf32>
    %cst_8 = arith.constant dense<0.000000e+00> : vector<256x8xf32>
    %9 = tpu.matmul %7, %8, %cst_8 {dimension_numbers = #tpu.dot_dimension_numbers<[1], [0], [0], [1], [0, 0, 1, 1], [], []>} : vector<256x16xf32>, vector<16x8xf32>, vector<256x8xf32> -> vector<256x8xf32>
    %c0_9 = arith.constant 0 : index
    %c0_10 = arith.constant 0 : index
    %10 = vector.load %arg5[%c0_9, %c0_10] : memref<1x8xf32, #tpu.memory_space<vmem>>, vector<1x8xf32>
    %11 = vector.broadcast %10 : vector<1x8xf32> to vector<256x8xf32>
    %12 = arith.addf %9, %11 : vector<256x8xf32>
    %c0_11 = arith.constant 0 : index
    %c0_12 = arith.constant 0 : index
    %13 = vector.load %arg6[%c0_11, %c0_12] : memref<256x8xf32, #tpu.memory_space<vmem>>, vector<256x8xf32>
    tpu.vector_store %arg6[%c0_11, %c0_12], %12 {strides = array<i32>} : memref<256x8xf32, #tpu.memory_space<vmem>>, vector<256x8xf32>,
    return
  }
  func.func @transform_0(%arg0: i32) -> (i32, i32) {
    %c0_i32 = arith.constant 0 : i32
    %c0_i32_0 = arith.constant 0 : i32
    return %arg0, %c0_i32 : i32, i32
  }
  func.func @transform_1(%arg0: i32) -> (i32, i32) {
    %c0_i32 = arith.constant 0 : i32
    %c0_i32_0 = arith.constant 0 : i32
    %c0_i32_1 = arith.constant 0 : i32
    return %c0_i32, %c0_i32_0 : i32, i32
  }
  func.func @transform_2(%arg0: i32) -> (i32, i32) {
    %c0_i32 = arith.constant 0 : i32
    %c0_i32_0 = arith.constant 0 : i32
    %c0_i32_1 = arith.constant 0 : i32
    return %c0_i32, %c0_i32_0 : i32, i32
  }
  func.func @transform_3(%arg0: i32) -> (i32, i32) {
    %c0_i32 = arith.constant 0 : i32
    %c0_i32_0 = arith.constant 0 : i32
    %c0_i32_1 = arith.constant 0 : i32
    return %c0_i32, %c0_i32_0 : i32, i32
  }
  func.func @transform_4(%arg0: i32) -> (i32, i32) {
    %c0_i32 = arith.constant 0 : i32
    %c0_i32_0 = arith.constant 0 : i32
    %c0_i32_1 = arith.constant 0 : i32
    return %c0_i32, %c0_i32_0 : i32, i32
  }
  func.func @transform_5(%arg0: i32) -> (i32, i32) {
    %c0_i32 = arith.constant 0 : i32
    %c0_i32_0 = arith.constant 0 : i32
    return %arg0, %c0_i32 : i32, i32
  }
}

</mosaic_0001>

<bundles_post_ra>
// kernel: tpu_custom_call.1
= control target key start
LH: loop header
LB: loop body
LE: loop exit
PB: predicated region body
PF: predicated region fallthrough
CT: control target
= control target key end

     0   :  { %vm60_vm0 = vcmask 261120   ;;  %vm308_vm1 = vcmask 130048   ;;  %vm518_vm2 = vcmask 64512   ;;  %s1040_s1 = inlined_call_operand.vmem [shape: f32[32,16], index: 1, kind: input, shape index: {}]   ;;  %s1041_s0 = inlined_call_operand.vmem [shape: f32[256,32], index: 0, kind: input, shape index: {}]   ;;  %s1042_s2 = inlined_call_operand.vmem [shape: f32[1,16], index: 2, kind: input, shape index: {}]   ;;  %s1043_s3 = inlined_call_operand.vmem [shape: f32[16,8], index: 3, kind: input, shape index: {}]   ;;  %s1044_s4 = inlined_call_operand.vmem [shape: f32[1,8], index: 4, kind: input, shape index: {}]   ;;  %s1045_s5 = inlined_call_operand.vmem [shape: f32[256,8], index: 5, kind: output, shape index: {}]  }
   0x1   :  { %v55_v0 = vld [vmem:[%s1040_s1 + $0x18] sm:$0xff]  ;;  %v54_v1 = vld [vmem:[%s1040_s1 + $0x10] sm:$0xff]  ;;  %v53_v2 = vld [vmem:[%s1040_s1 + $0x8] sm:$0xff] }
   0x2   :  { %169 = vmatpush.msra.mxu0 %v55_v0  ;;  %619 = vmatpush.msra.mxu2 %v55_v0  ;;  %v52_v3 = vld [vmem:[%s1040_s1] sm:$0xff]  ;;  %v21_v6 = vld [vmem:[%s1041_s0 + $0x8] sm:$0xff]  ;;  %v22_v8 = vld [vmem:[%s1041_s0 + $0x10] sm:$0xff] }
   0x3   :  { %v20_v4 = vld [vmem:[%s1041_s0] sm:$0xff]  ;;  %v37_v7 = vld [vmem:[%s1041_s0 + $0x88] sm:$0xff]  ;;  %v38_v9 = vld [vmem:[%s1041_s0 + $0x90] sm:$0xff] }
   0x4   :  { %170 = vmatpush.msra.mxu0 %v54_v1  ;;  %620 = vmatpush.msra.mxu2 %v54_v1  ;;  %v36_v5 = vld [vmem:[%s1041_s0 + $0x80] sm:$0xff]  ;;  %v23_v10 = vld [vmem:[%s1041_s0 + $0x18] sm:$0xff]  ;;  %v25_v14 = vld [vmem:[%s1041_s0 + $0x28] sm:$0xff] }
   0x5   :  { %v39_v11 = vld [vmem:[%s1041_s0 + $0x98] sm:$0xff]  ;;  %v24_v12 = vld [vmem:[%s1041_s0 + $0x20] sm:$0xff]  ;;  %v41_v15 = vld [vmem:[%s1041_s0 + $0xa8] sm:$0xff] }
   0x6   :  { %171 = vmatpush.msra.mxu0 %v53_v2  ;;  %621 = vmatpush.msra.mxu2 %v53_v2  ;;  %v40_v13 = vld [vmem:[%s1041_s0 + $0xa0] sm:$0xff]  ;;  %v26_v16 = vld [vmem:[%s1041_s0 + $0x30] sm:$0xff]  ;;  %v27_v18 = vld [vmem:[%s1041_s0 + $0x38] sm:$0xff] }
   0x7   :  { %v42_v17 = vld [vmem:[%s1041_s0 + $0xb0] sm:$0xff]  ;;  %v43_v19 = vld [vmem:[%s1041_s0 + $0xb8] sm:$0xff]  ;;  %v28_v20 = vld [vmem:[%s1041_s0 + $0x40] sm:$0xff] }
   0x8   :  { %172 = vmatpush.msra.mxu0 %v52_v3  ;;  %622 = vmatpush.msra.mxu2 %v52_v3  ;;  %v44_v21 = vld [vmem:[%s1041_s0 + $0xc0] sm:$0xff]  ;;  %v29_v22 = vld [vmem:[%s1041_s0 + $0x48] sm:$0xff]  ;;  %v30_v24 = vld [vmem:[%s1041_s0 + $0x50] sm:$0xff] }
   0x9   :  { %555 = vmatmul.msk.f32.vlgmr.msra.gmra.mxu0 %vm60_vm0, %v20_v4  ;;  %571 = vmatmul.msk.f32.vlgmr.msra.gmra.mxu2 %vm60_vm0, %v36_v5  ;;  %v45_v23 = vld [vmem:[%s1041_s0 + $0xc8] sm:$0xff]  ;;  %v46_v25 = vld [vmem:[%s1041_s0 + $0xd0] sm:$0xff]  ;;  %v31_v26 = vld [vmem:[%s1041_s0 + $0x58] sm:$0xff] }
   0xa   :  { %v47_v27 = vld [vmem:[%s1041_s0 + $0xd8] sm:$0xff]  ;;  %v32_v28 = vld [vmem:[%s1041_s0 + $0x60] sm:$0xff]  ;;  %v303_v30 = vld [vmem:[%s1043_s3 + $0x8] sm:$0xff] }
   0xb   :  { %v48_v29 = vld [vmem:[%s1041_s0 + $0xe0] sm:$0xff]  ;;  %419 = vmatpush.msra.mxu1 %v303_v30  ;;  %623 = vmatpush.msra.mxu3 %v303_v30  ;;  %v33_v32 = vld [vmem:[%s1041_s0 + $0x68] sm:$0xff]  ;;  %v34_v34 = vld [vmem:[%s1041_s0 + $0x70] sm:$0xff] }
   0xc   :  { %v302_v31 = vld [vmem:[%s1043_s3] sm:$0xff]  ;;  %v49_v33 = vld [vmem:[%s1041_s0 + $0xe8] sm:$0xff]  ;;  %v50_v35 = vld [vmem:[%s1041_s0 + $0xf0] sm:$0xff] }
   0xd   :  { %420 = vmatpush.msra.mxu1 %v302_v31  ;;  %624 = vmatpush.msra.mxu3 %v302_v31  ;;  %v35_v36 = vld [vmem:[%s1041_s0 + $0x78] sm:$0xff]  ;;  %v806_v38 = vld [vmem:[%s1042_s2] ss:$0 sm:$0xff] }
   0xe   :  { %v51_v37 = vld [vmem:[%s1041_s0 + $0xf8] sm:$0xff] }
  0x11   :  { %556 = vmatmul.msk.f32.gmra.mxu0 %vm60_vm0, %v21_v6  ;;  %572 = vmatmul.msk.f32.gmra.mxu2 %vm60_vm0, %v37_v7 }
  0x19   :  { %557 = vmatmul.msk.f32.gmra.mxu0 %vm60_vm0, %v22_v8  ;;  %573 = vmatmul.msk.f32.gmra.mxu2 %vm60_vm0, %v38_v9 }
  0x21   :  { %558 = vmatmul.msk.f32.gmra.mxu0 %vm60_vm0, %v23_v10  ;;  %574 = vmatmul.msk.f32.gmra.mxu2 %vm60_vm0, %v39_v11 }
  0x29   :  { %559 = vmatmul.msk.f32.gmra.mxu0 %vm60_vm0, %v24_v12  ;;  %575 = vmatmul.msk.f32.gmra.mxu2 %vm60_vm0, %v40_v13 }
  0x31   :  { %560 = vmatmul.msk.f32.gmra.mxu0 %vm60_vm0, %v25_v14  ;;  %576 = vmatmul.msk.f32.gmra.mxu2 %vm60_vm0, %v41_v15 }
  0x39   :  { %561 = vmatmul.msk.f32.gmra.mxu0 %vm60_vm0, %v26_v16  ;;  %577 = vmatmul.msk.f32.gmra.mxu2 %vm60_vm0, %v42_v17 }
  0x41   :  { %562 = vmatmul.msk.f32.gmra.mxu0 %vm60_vm0, %v27_v18  ;;  %578 = vmatmul.msk.f32.gmra.mxu2 %vm60_vm0, %v43_v19 }
  0x49   :  { %563 = vmatmul.msk.f32.gmra.mxu0 %vm60_vm0, %v28_v20  ;;  %579 = vmatmul.msk.f32.gmra.mxu2 %vm60_vm0, %v44_v21 }
  0x51   :  { %564 = vmatmul.msk.f32.gmra.mxu0 %vm60_vm0, %v29_v22  ;;  %580 = vmatmul.msk.f32.gmra.mxu2 %vm60_vm0, %v45_v23 }
  0x59   :  { %565 = vmatmul.msk.f32.gmra.mxu0 %vm60_vm0, %v30_v24  ;;  %581 = vmatmul.msk.f32.gmra.mxu2 %vm60_vm0, %v46_v25 }
  0x61   :  { %566 = vmatmul.msk.f32.gmra.mxu0 %vm60_vm0, %v31_v26  ;;  %582 = vmatmul.msk.f32.gmra.mxu2 %vm60_vm0, %v47_v27 }
  0x69   :  { %567 = vmatmul.msk.f32.gmra.mxu0 %vm60_vm0, %v32_v28  ;;  %583 = vmatmul.msk.f32.gmra.mxu2 %vm60_vm0, %v48_v29 }
  0x71   :  { %568 = vmatmul.msk.f32.gmra.mxu0 %vm60_vm0, %v33_v32  ;;  %584 = vmatmul.msk.f32.gmra.mxu2 %vm60_vm0, %v49_v33 }
  0x79   :  { %569 = vmatmul.msk.f32.gmra.mxu0 %vm60_vm0, %v34_v34  ;;  %585 = vmatmul.msk.f32.gmra.mxu2 %vm60_vm0, %v50_v35 }
  0x81   :  { %570 = vmatmul.msk.f32.gmra.mxu0 %vm60_vm0, %v35_v36  ;;  %586 = vmatmul.msk.f32.gmra.mxu2 %vm60_vm0, %v51_v37 }
  0x86   :  { %v174_v39 = vpop.f32.mrf.mxu0 }
  0x87   :  { %v175_v40 = vadd.f32 %v806_v38, %v174_v39 }
  0x89   :  { %v270_v41 = vmax.f32 %v175_v40, 0.0 }
  0x8b   :  { %587 = vmatmul.msk.f32.vlgmr.msra.gmra.mxu1 %vm308_vm1, %v270_v41 }
  0x8c   :  { %v810_v42 = vpop.f32.mrf.mxu2 }
  0x8e   :  { %v177_v43 = vpop.f32.mrf.mxu0 }
  0x8f   :  { %v178_v44 = vadd.f32 %v806_v38, %v177_v43 }
  0x91   :  { %v271_v45 = vmax.f32 %v178_v44, 0.0 }
  0x93   :  { %588 = vmatmul.msk.f32.gmra.mxu1 %vm308_vm1, %v271_v45 }
  0x94   :  { %v225_v46 = vpop.f32.mrf.mxu2 }
  0x95   :  { %v226_v47 = vadd.f32 %v806_v38, %v225_v46 }
  0x96   :  { %v180_v48 = vpop.f32.mrf.mxu0 }
  0x97   :  { %v287_v49 = vmax.f32 %v226_v47, 0.0  ;;  %v181_v50 = vadd.f32 %v806_v38, %v180_v48 }
  0x99   :  { %v272_v51 = vmax.f32 %v181_v50, 0.0  ;;  %604 = vmatmul.msk.f32.vlgmr.msra.gmra.mxu3 %vm308_vm1, %v287_v49 }
  0x9b   :  { %589 = vmatmul.msk.f32.gmra.mxu1 %vm308_vm1, %v272_v51 }
  0x9c   :  { %v228_v52 = vpop.f32.mrf.mxu2 }
  0x9d   :  { %v229_v53 = vadd.f32 %v806_v38, %v228_v52 }
  0x9e   :  { %v183_v54 = vpop.f32.mrf.mxu0 }
  0x9f   :  { %v288_v55 = vmax.f32 %v229_v53, 0.0  ;;  %v184_v56 = vadd.f32 %v806_v38, %v183_v54 }
  0xa1   :  { %v273_v57 = vmax.f32 %v184_v56, 0.0  ;;  %605 = vmatmul.msk.f32.gmra.mxu3 %vm308_vm1, %v288_v55 }
  0xa3   :  { %590 = vmatmul.msk.f32.gmra.mxu1 %vm308_vm1, %v273_v57 }
  0xa4   :  { %v231_v58 = vpop.f32.mrf.mxu2 }
  0xa5   :  { %v232_v59 = vadd.f32 %v806_v38, %v231_v58 }
  0xa6   :  { %v186_v60 = vpop.f32.mrf.mxu0 }
  0xa7   :  { %v289_v61 = vmax.f32 %v232_v59, 0.0  ;;  %v187_v62 = vadd.f32 %v806_v38, %v186_v60 }
  0xa9   :  { %v274_v63 = vmax.f32 %v187_v62, 0.0  ;;  %606 = vmatmul.msk.f32.gmra.mxu3 %vm308_vm1, %v289_v61 }
  0xab   :  { %591 = vmatmul.msk.f32.gmra.mxu1 %vm308_vm1, %v274_v63 }
  0xac   :  { %v234_v0 = vpop.f32.mrf.mxu2 }
  0xad   :  { %v235_v1 = vadd.f32 %v806_v38, %v234_v0 }
  0xae   :  { %v189_v2 = vpop.f32.mrf.mxu0 }
  0xaf   :  { %v290_v3 = vmax.f32 %v235_v1, 0.0  ;;  %v190_v4 = vadd.f32 %v806_v38, %v189_v2 }
  0xb1   :  { %v275_v5 = vmax.f32 %v190_v4, 0.0  ;;  %607 = vmatmul.msk.f32.gmra.mxu3 %vm308_vm1, %v290_v3 }
  0xb3   :  { %592 = vmatmul.msk.f32.gmra.mxu1 %vm308_vm1, %v275_v5  ;;  %v223_v5 = vadd.f32 %v806_v38, %v810_v42 }
  0xb4   :  { %v237_v6 = vpop.f32.mrf.mxu2 }
  0xb5   :  { %v238_v7 = vadd.f32 %v806_v38, %v237_v6 }
  0xb6   :  { %v192_v8 = vpop.f32.mrf.mxu0 }
  0xb7   :  { %v291_v9 = vmax.f32 %v238_v7, 0.0  ;;  %v193_v10 = vadd.f32 %v806_v38, %v192_v8  ;;  %v876_v7 = vld [vmem:[%s1044_s4] ss:$0 sm:$0xff] }
  0xb9   :  { %v276_v11 = vmax.f32 %v193_v10, 0.0  ;;  %608 = vmatmul.msk.f32.gmra.mxu3 %vm308_vm1, %v291_v9  ;;  %v286_v10 = vmax.f32 %v223_v5, 0.0 }
  0xbb   :  { %593 = vmatmul.msk.f32.gmra.mxu1 %vm308_vm1, %v276_v11 }
  0xbc   :  { %v240_v12 = vpop.f32.mrf.mxu2 }
  0xbd   :  { %v241_v13 = vadd.f32 %v806_v38, %v240_v12 }
  0xbe   :  { %v195_v14 = vpop.f32.mrf.mxu0 }
  0xbf   :  { %v292_v15 = vmax.f32 %v241_v13, 0.0  ;;  %v196_v16 = vadd.f32 %v806_v38, %v195_v14 }
  0xc1   :  { %v277_v17 = vmax.f32 %v196_v16, 0.0  ;;  %609 = vmatmul.msk.f32.gmra.mxu3 %vm308_vm1, %v292_v15 }
  0xc3   :  { %594 = vmatmul.msk.f32.gmra.mxu1 %vm308_vm1, %v277_v17 }
  0xc4   :  { %v243_v18 = vpop.f32.mrf.mxu2 }
  0xc5   :  { %v244_v19 = vadd.f32 %v806_v38, %v243_v18 }
  0xc6   :  { %v198_v20 = vpop.f32.mrf.mxu0 }
  0xc7   :  { %v293_v21 = vmax.f32 %v244_v19, 0.0  ;;  %v199_v22 = vadd.f32 %v806_v38, %v198_v20 }
  0xc9   :  { %v278_v23 = vmax.f32 %v199_v22, 0.0  ;;  %610 = vmatmul.msk.f32.gmra.mxu3 %vm308_vm1, %v293_v21 }
  0xcb   :  { %595 = vmatmul.msk.f32.gmra.mxu1 %vm308_vm1, %v278_v23 }
  0xcc   :  { %v246_v24 = vpop.f32.mrf.mxu2 }
  0xcd   :  { %v247_v25 = vadd.f32 %v806_v38, %v246_v24 }
  0xce   :  { %v201_v26 = vpop.f32.mrf.mxu0 }
  0xcf   :  { %v294_v27 = vmax.f32 %v247_v25, 0.0  ;;  %v202_v28 = vadd.f32 %v806_v38, %v201_v26 }
  0xd1   :  { %v279_v29 = vmax.f32 %v202_v28, 0.0  ;;  %611 = vmatmul.msk.f32.gmra.mxu3 %vm308_vm1, %v294_v27 }
  0xd3   :  { %596 = vmatmul.msk.f32.gmra.mxu1 %vm308_vm1, %v279_v29 }
  0xd4   :  { %v249_v30 = vpop.f32.mrf.mxu2 }
  0xd5   :  { %v250_v31 = vadd.f32 %v806_v38, %v249_v30 }
  0xd6   :  { %v204_v32 = vpop.f32.mrf.mxu0 }
  0xd7   :  { %v295_v33 = vmax.f32 %v250_v31, 0.0  ;;  %v205_v34 = vadd.f32 %v806_v38, %v204_v32 }
  0xd9   :  { %v280_v35 = vmax.f32 %v205_v34, 0.0  ;;  %612 = vmatmul.msk.f32.gmra.mxu3 %vm308_vm1, %v295_v33 }
  0xdb   :  { %597 = vmatmul.msk.f32.gmra.mxu1 %vm308_vm1, %v280_v35 }
  0xdc   :  { %v252_v36 = vpop.f32.mrf.mxu2 }
  0xdd   :  { %v253_v37 = vadd.f32 %v806_v38, %v252_v36 }
  0xde   :  { %v207_v39 = vpop.f32.mrf.mxu0 }
  0xdf   :  { %v296_v40 = vmax.f32 %v253_v37, 0.0  ;;  %v208_v41 = vadd.f32 %v806_v38, %v207_v39 }
  0xe1   :  { %v281_v43 = vmax.f32 %v208_v41, 0.0  ;;  %613 = vmatmul.msk.f32.gmra.mxu3 %vm308_vm1, %v296_v40 }
  0xe3   :  { %598 = vmatmul.msk.f32.gmra.mxu1 %vm308_vm1, %v281_v43 }
  0xe4   :  { %v255_v44 = vpop.f32.mrf.mxu2 }
  0xe5   :  { %v256_v45 = vadd.f32 %v806_v38, %v255_v44 }
  0xe6   :  { %v210_v46 = vpop.f32.mrf.mxu0 }
  0xe7   :  { %v297_v47 = vmax.f32 %v256_v45, 0.0  ;;  %v211_v48 = vadd.f32 %v806_v38, %v210_v46 }
  0xe9   :  { %v282_v49 = vmax.f32 %v211_v48, 0.0  ;;  %614 = vmatmul.msk.f32.gmra.mxu3 %vm308_vm1, %v297_v47 }
  0xeb   :  { %599 = vmatmul.msk.f32.gmra.mxu1 %vm308_vm1, %v282_v49 }
  0xec   :  { %v258_v50 = vpop.f32.mrf.mxu2 }
  0xed   :  { %v259_v51 = vadd.f32 %v806_v38, %v258_v50 }
  0xee   :  { %v213_v52 = vpop.f32.mrf.mxu0 }
  0xef   :  { %v298_v53 = vmax.f32 %v259_v51, 0.0  ;;  %v214_v54 = vadd.f32 %v806_v38, %v213_v52 }
  0xf1   :  { %v283_v55 = vmax.f32 %v214_v54, 0.0  ;;  %615 = vmatmul.msk.f32.gmra.mxu3 %vm308_vm1, %v298_v53 }
  0xf3   :  { %600 = vmatmul.msk.f32.gmra.mxu1 %vm308_vm1, %v283_v55 }
  0xf4   :  { %v261_v56 = vpop.f32.mrf.mxu2 }
  0xf5   :  { %v262_v57 = vadd.f32 %v806_v38, %v261_v56 }
  0xf6   :  { %v216_v58 = vpop.f32.mrf.mxu0 }
  0xf7   :  { %v299_v59 = vmax.f32 %v262_v57, 0.0  ;;  %v217_v60 = vadd.f32 %v806_v38, %v216_v58 }
  0xf9   :  { %v284_v61 = vmax.f32 %v217_v60, 0.0  ;;  %616 = vmatmul.msk.f32.gmra.mxu3 %vm308_vm1, %v299_v59 }
  0xfb   :  { %601 = vmatmul.msk.f32.gmra.mxu1 %vm308_vm1, %v284_v61 }
  0xfc   :  { %v264_v62 = vpop.f32.mrf.mxu2 }
  0xfd   :  { %v265_v63 = vadd.f32 %v806_v38, %v264_v62 }
  0xfe   :  { %v219_v0 = vpop.f32.mrf.mxu0 }
  0xff   :  { %v300_v1 = vmax.f32 %v265_v63, 0.0  ;;  %v220_v2 = vadd.f32 %v806_v38, %v219_v0 }
 0x101   :  { %v285_v3 = vmax.f32 %v220_v2, 0.0  ;;  %617 = vmatmul.msk.f32.gmra.mxu3 %vm308_vm1, %v300_v1 }
 0x103   :  { %602 = vmatmul.msk.f32.gmra.mxu1 %vm308_vm1, %v285_v3 }
 0x104   :  { %v267_v4 = vpop.f32.mrf.mxu2 }
 0x105   :  { %v268_v6 = vadd.f32 %v806_v38, %v267_v4 }
 0x107   :  { %v301_v8 = vmax.f32 %v268_v6, 0.0 }
 0x108   :  { %v422_v9 = vpop.f32.mrf.mxu1 }
 0x109   :  { %v423_v11 = vadd.f32 %v876_v7, %v422_v9  ;;  %618 = vmatmul.msk.f32.gmra.mxu3 %vm308_vm1, %v301_v8 }
 0x10b   :  { %519 = vst.msk [vmem:[%s1045_s5] sm:$0xff] %vm518_vm2, %v423_v11  ;;  %603 = vmatmul.msk.f32.gmra.mxu1 %vm308_vm1, %v286_v10 }
 0x110   :  { %v425_v38 = vpop.f32.mrf.mxu1 }
 0x111   :  { %v426_v42 = vadd.f32 %v876_v7, %v425_v38 }
 0x113   :  { %520 = vst.msk [vmem:[%s1045_s5 + $0x8] sm:$0xff] %vm518_vm2, %v426_v42 }
 0x118   :  { %v428_v12 = vpop.f32.mrf.mxu1 }
 0x119   :  { %v429_v13 = vadd.f32 %v876_v7, %v428_v12 }
 0x11b   :  { %521 = vst.msk [vmem:[%s1045_s5 + $0x10] sm:$0xff] %vm518_vm2, %v429_v13 }
 0x11c   :  { %v473_v14 = vpop.f32.mrf.mxu3 }
 0x11d   :  { %v474_v15 = vadd.f32 %v876_v7, %v473_v14 }
 0x11f   :  { %536 = vst.msk [vmem:[%s1045_s5 + $0x88] sm:$0xff] %vm518_vm2, %v474_v15 }
 0x120   :  { %v431_v16 = vpop.f32.mrf.mxu1 }
 0x121   :  { %v432_v17 = vadd.f32 %v876_v7, %v431_v16 }
 0x123   :  { %522 = vst.msk [vmem:[%s1045_s5 + $0x18] sm:$0xff] %vm518_vm2, %v432_v17 }
 0x124   :  { %v476_v18 = vpop.f32.mrf.mxu3 }
 0x125   :  { %v477_v19 = vadd.f32 %v876_v7, %v476_v18 }
 0x127   :  { %537 = vst.msk [vmem:[%s1045_s5 + $0x90] sm:$0xff] %vm518_vm2, %v477_v19 }
 0x128   :  { %v434_v20 = vpop.f32.mrf.mxu1 }
 0x129   :  { %v435_v21 = vadd.f32 %v876_v7, %v434_v20 }
 0x12b   :  { %523 = vst.msk [vmem:[%s1045_s5 + $0x20] sm:$0xff] %vm518_vm2, %v435_v21 }
 0x12c   :  { %v479_v22 = vpop.f32.mrf.mxu3 }
 0x12d   :  { %v480_v23 = vadd.f32 %v876_v7, %v479_v22 }
 0x12f   :  { %538 = vst.msk [vmem:[%s1045_s5 + $0x98] sm:$0xff] %vm518_vm2, %v480_v23 }
 0x130   :  { %v437_v24 = vpop.f32.mrf.mxu1 }
 0x131   :  { %v438_v25 = vadd.f32 %v876_v7, %v437_v24 }
 0x133   :  { %524 = vst.msk [vmem:[%s1045_s5 + $0x28] sm:$0xff] %vm518_vm2, %v438_v25 }
 0x134   :  { %v482_v26 = vpop.f32.mrf.mxu3 }
 0x135   :  { %v483_v27 = vadd.f32 %v876_v7, %v482_v26 }
 0x137   :  { %539 = vst.msk [vmem:[%s1045_s5 + $0xa0] sm:$0xff] %vm518_vm2, %v483_v27 }
 0x138   :  { %v440_v28 = vpop.f32.mrf.mxu1 }
 0x139   :  { %v441_v29 = vadd.f32 %v876_v7, %v440_v28 }
 0x13b   :  { %525 = vst.msk [vmem:[%s1045_s5 + $0x30] sm:$0xff] %vm518_vm2, %v441_v29 }
 0x13c   :  { %v485_v30 = vpop.f32.mrf.mxu3 }
 0x13d   :  { %v486_v31 = vadd.f32 %v876_v7, %v485_v30 }
 0x13f   :  { %540 = vst.msk [vmem:[%s1045_s5 + $0xa8] sm:$0xff] %vm518_vm2, %v486_v31 }
 0x140   :  { %v443_v32 = vpop.f32.mrf.mxu1 }
 0x141   :  { %v444_v33 = vadd.f32 %v876_v7, %v443_v32 }
 0x143   :  { %526 = vst.msk [vmem:[%s1045_s5 + $0x38] sm:$0xff] %vm518_vm2, %v444_v33 }
 0x144   :  { %v488_v34 = vpop.f32.mrf.mxu3 }
 0x145   :  { %v489_v35 = vadd.f32 %v876_v7, %v488_v34 }
 0x147   :  { %541 = vst.msk [vmem:[%s1045_s5 + $0xb0] sm:$0xff] %vm518_vm2, %v489_v35 }
 0x148   :  { %v446_v36 = vpop.f32.mrf.mxu1 }
 0x149   :  { %v447_v37 = vadd.f32 %v876_v7, %v446_v36 }
 0x14b   :  { %527 = vst.msk [vmem:[%s1045_s5 + $0x40] sm:$0xff] %vm518_vm2, %v447_v37 }
 0x14c   :  { %v491_v39 = vpop.f32.mrf.mxu3 }
 0x14d   :  { %v492_v40 = vadd.f32 %v876_v7, %v491_v39 }
 0x14f   :  { %542 = vst.msk [vmem:[%s1045_s5 + $0xb8] sm:$0xff] %vm518_vm2, %v492_v40 }
 0x150   :  { %v449_v41 = vpop.f32.mrf.mxu1 }
 0x151   :  { %v450_v43 = vadd.f32 %v876_v7, %v449_v41 }
 0x153   :  { %528 = vst.msk [vmem:[%s1045_s5 + $0x48] sm:$0xff] %vm518_vm2, %v450_v43 }
 0x154   :  { %v494_v44 = vpop.f32.mrf.mxu3 }
 0x155   :  { %v495_v45 = vadd.f32 %v876_v7, %v494_v44 }
 0x157   :  { %543 = vst.msk [vmem:[%s1045_s5 + $0xc0] sm:$0xff] %vm518_vm2, %v495_v45 }
 0x158   :  { %v452_v46 = vpop.f32.mrf.mxu1 }
 0x159   :  { %v453_v47 = vadd.f32 %v876_v7, %v452_v46 }
 0x15b   :  { %529 = vst.msk [vmem:[%s1045_s5 + $0x50] sm:$0xff] %vm518_vm2, %v453_v47 }
 0x15c   :  { %v497_v48 = vpop.f32.mrf.mxu3 }
 0x15d   :  { %v498_v49 = vadd.f32 %v876_v7, %v497_v48 }
 0x15f   :  { %544 = vst.msk [vmem:[%s1045_s5 + $0xc8] sm:$0xff] %vm518_vm2, %v498_v49 }
 0x160   :  { %v455_v50 = vpop.f32.mrf.mxu1 }
 0x161   :  { %v456_v51 = vadd.f32 %v876_v7, %v455_v50 }
 0x163   :  { %530 = vst.msk [vmem:[%s1045_s5 + $0x58] sm:$0xff] %vm518_vm2, %v456_v51 }
 0x164   :  { %v500_v52 = vpop.f32.mrf.mxu3 }
 0x165   :  { %v501_v53 = vadd.f32 %v876_v7, %v500_v52 }
 0x167   :  { %545 = vst.msk [vmem:[%s1045_s5 + $0xd0] sm:$0xff] %vm518_vm2, %v501_v53 }
 0x168   :  { %v458_v54 = vpop.f32.mrf.mxu1 }
 0x169   :  { %v459_v55 = vadd.f32 %v876_v7, %v458_v54 }
 0x16b   :  { %531 = vst.msk [vmem:[%s1045_s5 + $0x60] sm:$0xff] %vm518_vm2, %v459_v55 }
 0x16c   :  { %v503_v56 = vpop.f32.mrf.mxu3 }
 0x16d   :  { %v504_v57 = vadd.f32 %v876_v7, %v503_v56 }
 0x16f   :  { %546 = vst.msk [vmem:[%s1045_s5 + $0xd8] sm:$0xff] %vm518_vm2, %v504_v57 }
 0x170   :  { %v461_v58 = vpop.f32.mrf.mxu1 }
 0x171   :  { %v462_v59 = vadd.f32 %v876_v7, %v461_v58 }
 0x173   :  { %532 = vst.msk [vmem:[%s1045_s5 + $0x68] sm:$0xff] %vm518_vm2, %v462_v59 }
 0x174   :  { %v506_v60 = vpop.f32.mrf.mxu3 }
 0x175   :  { %v507_v61 = vadd.f32 %v876_v7, %v506_v60 }
 0x177   :  { %547 = vst.msk [vmem:[%s1045_s5 + $0xe0] sm:$0xff] %vm518_vm2, %v507_v61 }
 0x178   :  { %v464_v62 = vpop.f32.mrf.mxu1 }
 0x179   :  { %v465_v63 = vadd.f32 %v876_v7, %v464_v62 }
 0x17b   :  { %533 = vst.msk [vmem:[%s1045_s5 + $0x70] sm:$0xff] %vm518_vm2, %v465_v63 }
 0x17c   :  { %v509_v0 = vpop.f32.mrf.mxu3 }
 0x17d   :  { %v510_v1 = vadd.f32 %v876_v7, %v509_v0 }
 0x17f   :  { %548 = vst.msk [vmem:[%s1045_s5 + $0xe8] sm:$0xff] %vm518_vm2, %v510_v1 }
 0x180   :  { %v467_v2 = vpop.f32.mrf.mxu1 }
 0x181   :  { %v468_v3 = vadd.f32 %v876_v7, %v467_v2 }
 0x183   :  { %534 = vst.msk [vmem:[%s1045_s5 + $0x78] sm:$0xff] %vm518_vm2, %v468_v3 }
 0x184   :  { %v512_v4 = vpop.f32.mrf.mxu3 }
 0x185   :  { %v513_v5 = vadd.f32 %v876_v7, %v512_v4 }
 0x187   :  { %549 = vst.msk [vmem:[%s1045_s5 + $0xf0] sm:$0xff] %vm518_vm2, %v513_v5 }
 0x188   :  { %v470_v6 = vpop.f32.mrf.mxu1 }
 0x189   :  { %v471_v8 = vadd.f32 %v876_v7, %v470_v6 }
 0x18b   :  { %535 = vst.msk [vmem:[%s1045_s5 + $0x80] sm:$0xff] %vm518_vm2, %v471_v8 }
 0x18c   :  { %v515_v9 = vpop.f32.mrf.mxu3 }
 0x18d   :  { %v516_v10 = vadd.f32 %v876_v7, %v515_v9 }
 0x18f   :  { %550 = vst.msk [vmem:[%s1045_s5 + $0xf8] sm:$0xff] %vm518_vm2, %v516_v10 }

</bundles_post_ra>
